<compile_context>
chip_gen: v6e
topology: v6e:2x2x1
jax: 0.10.0
libtpu: 0.0.40
codegen_flags: <defaults>
</compile_context>

<pallas_src>
import functools
import math

import jax
import jax.numpy as jnp
from jax.experimental import pallas as pl
from jax.experimental.pallas import tpu as pltpu


# ----------------------------------------------------------------------------
# Small static helpers
# ----------------------------------------------------------------------------
def _ceil_to(v, m):
    return ((v + m - 1) // m) * m


def _pick_div(total, candidates):
    for c in candidates:
        if total % c == 0:
            return c
    return candidates[-1]


def _row_tile(rows, cols, elem_bytes=4, budget=1 << 20):
    """Row-tile size (multiple of 8) so one block stays within `budget` bytes."""
    per_row = max(1, cols) * elem_bytes
    cap = max(8, (budget // per_row) // 8 * 8)
    return min(_ceil_to(rows, 8), cap)


def _to2d(x):
    """Flatten to 2-D, folding trailing dims until the lane dim is >= 128.

    Makes num_classes=1 decoder tensors lane-dense instead of width-1."""
    shape = x.shape
    if len(shape) == 2:
        return x, shape
    last, i = 1, len(shape)
    while i > 1 and last < 128:
        i -= 1
        last *= shape[i]
    lead = 1
    for d in shape[:i]:
        lead *= d
    return x.reshape(lead, last), shape


# ----------------------------------------------------------------------------
# Pallas kernels
# ----------------------------------------------------------------------------
def _mm_kernel(x_ref, w_ref, s_ref, o_ref, acc_ref, *, relu):
    """Tiled o = maybe_relu(x @ w + shift); K is the innermost grid axis."""
    @pl.when(pl.program_id(2) == 0)
    def _init():
        acc_ref[...] = jnp.zeros_like(acc_ref)

    acc_ref[...] += jnp.dot(x_ref[...], w_ref[...],
                            preferred_element_type=jnp.float32)

    @pl.when(pl.program_id(2) == pl.num_programs(2) - 1)
    def _done():
        r = acc_ref[...] + s_ref[...]
        if relu:
            r = jnp.maximum(r, 0.0)
        o_ref[...] = r


def _mm_small_kernel(a_ref, b_ref, s_ref, o_ref, *, relu):
    """Lane-dense o = maybe_relu(a @ b + shift) for tiny row counts (no K grid)."""
    acc = jnp.dot(a_ref[...], b_ref[...], preferred_element_type=jnp.float32)
    acc = acc + s_ref[...]
    if relu:
        acc = jnp.maximum(acc, 0.0)
    o_ref[...] = acc


def _add_kernel(a_ref, b_ref, o_ref, *, relu):
    v = a_ref[...] + b_ref[...]
    if relu:
        v = jnp.maximum(v, 0.0)
    o_ref[...] = v


def _affine_kernel(a_ref, s_ref, t_ref, o_ref, *, relu):
    v = a_ref[...] * s_ref[...] + t_ref[...]
    if relu:
        v = jnp.maximum(v, 0.0)
    o_ref[...] = v


def _max_kernel(p_ref, o_ref):
    o_ref[...] = jnp.max(p_ref[...], axis=0)


# ----------------------------------------------------------------------------
# Jitted Pallas wrappers (one trace/compile per shape signature)
# ----------------------------------------------------------------------------
@functools.partial(jax.jit, static_argnames=("relu",))
def matmul_shift(x, w, shift, relu=False):
    """(M,K) @ (K,N) + shift[N] (+ReLU); bf16 operands, f32 accumulation."""
    m, k = x.shape
    _, n = w.shape
    kp = _ceil_to(k, 128)
    np_ = _ceil_to(n, 128)
    tk = _pick_div(kp, (512, 384, 256, 128))
    tn = _pick_div(np_, (512, 256, 128))
    tm = 512 if m >= 512 else _ceil_to(m, 8)
    mp = _ceil_to(m, tm)
    xb = jnp.pad(x.astype(jnp.bfloat16), ((0, mp - m), (0, kp - k)))
    wb = jnp.pad(w.astype(jnp.bfloat16), ((0, kp - k), (0, np_ - n)))
    sb = jnp.pad(shift.astype(jnp.float32).reshape(1, n),
                 ((0, 0), (0, np_ - n)))
    out = pl.pallas_call(
        functools.partial(_mm_kernel, relu=relu),
        out_shape=jax.ShapeDtypeStruct((mp, np_), jnp.float32),
        grid=(mp // tm, np_ // tn, kp // tk),
        in_specs=[pl.BlockSpec((tm, tk), lambda i, j, kk: (i, kk)),
                  pl.BlockSpec((tk, tn), lambda i, j, kk: (kk, j)),
                  pl.BlockSpec((1, tn), lambda i, j, kk: (0, j))],
        out_specs=pl.BlockSpec((tm, tn), lambda i, j, kk: (i, j)),
        scratch_shapes=[pltpu.VMEM((tm, tn), jnp.float32)],
        compiler_params=pltpu.CompilerParams(
            dimension_semantics=("parallel", "parallel", "arbitrary")),
    )(xb, wb, sb)
    return out[:m, :n]


@functools.partial(jax.jit, static_argnames=("relu",))
def matmul_small(a, b, shift, relu=False):
    """Lane-dense (P,K) @ (K,M) + shift[P] for tiny P (num_classes decoder)."""
    p, k = a.shape
    _, m = b.shape
    pp = _ceil_to(p, 8)
    kp = _ceil_to(k, 16)
    tn = _ceil_to(min(m, 2048), 128)
    tn = min(tn, max(128, ((4 << 20) // (kp * 2)) // 128 * 128))
    mp = _ceil_to(m, tn)
    ab = jnp.pad(a.astype(jnp.bfloat16), ((0, pp - p), (0, kp - k)))
    bb = jnp.pad(b.astype(jnp.bfloat16), ((0, kp - k), (0, mp - m)))
    sb = jnp.pad(shift.astype(jnp.float32).reshape(p, 1), ((0, pp - p), (0, 0)))
    out = pl.pallas_call(
        functools.partial(_mm_small_kernel, relu=relu),
        out_shape=jax.ShapeDtypeStruct((pp, mp), jnp.float32),
        grid=(mp // tn,),
        in_specs=[pl.BlockSpec((pp, kp), lambda j: (0, 0)),
                  pl.BlockSpec((kp, tn), lambda j: (0, j)),
                  pl.BlockSpec((pp, 1), lambda j: (0, 0))],
        out_specs=pl.BlockSpec((pp, tn), lambda j: (0, j)),
        compiler_params=pltpu.CompilerParams(
            dimension_semantics=("parallel",)),
    )(ab, bb, sb)
    return out[:p, :m]


@functools.partial(jax.jit, static_argnames=("relu",))
def add_op(a, b, relu=False):
    """maybe_relu(a + b), lane-dense flattening, gridded over rows."""
    a2, shape = _to2d(a)
    b2 = b.reshape(a2.shape)
    r, c = a2.shape
    tm = _row_tile(r, c)
    rp = _ceil_to(r, tm)
    ap = jnp.pad(a2, ((0, rp - r), (0, 0)))
    bp = jnp.pad(b2, ((0, rp - r), (0, 0)))
    out = pl.pallas_call(
        functools.partial(_add_kernel, relu=relu),
        out_shape=jax.ShapeDtypeStruct((rp, c), jnp.float32),
        grid=(rp // tm,),
        in_specs=[pl.BlockSpec((tm, c), lambda i: (i, 0))] * 2,
        out_specs=pl.BlockSpec((tm, c), lambda i: (i, 0)),
        compiler_params=pltpu.CompilerParams(
            dimension_semantics=("parallel",)),
    )(ap, bp)
    return out[:r].reshape(shape)


@functools.partial(jax.jit, static_argnames=("relu",))
def affine_op(x, scale, shift, relu=False):
    """maybe_relu(x * scale + shift); scale/shift per channel (last dim)."""
    shape = x.shape
    c = shape[-1]
    if c == 1:
        x2, _ = _to2d(x)                      # lane-dense for num_classes == 1
        s2 = jnp.full((1, x2.shape[1]), scale[0], jnp.float32)
        t2 = jnp.full((1, x2.shape[1]), shift[0], jnp.float32)
    else:
        x2 = x.reshape(-1, c)
        s2 = scale.reshape(1, c).astype(jnp.float32)
        t2 = shift.reshape(1, c).astype(jnp.float32)
    r, cl = x2.shape
    tm = _row_tile(r, cl)
    rp = _ceil_to(r, tm)
    xp = jnp.pad(x2, ((0, rp - r), (0, 0)))
    out = pl.pallas_call(
        functools.partial(_affine_kernel, relu=relu),
        out_shape=jax.ShapeDtypeStruct((rp, cl), jnp.float32),
        grid=(rp // tm,),
        in_specs=[pl.BlockSpec((tm, cl), lambda i: (i, 0)),
                  pl.BlockSpec((1, cl), lambda i: (0, 0)),
                  pl.BlockSpec((1, cl), lambda i: (0, 0))],
        out_specs=pl.BlockSpec((tm, cl), lambda i: (i, 0)),
        compiler_params=pltpu.CompilerParams(
            dimension_semantics=("parallel",)),
    )(xp, s2, t2)
    return out[:r].reshape(shape)


@jax.jit
def maxpool_3x3_s2(x):
    """3x3 stride-2 max pool (padding 1), 9-tap max reduction gridded over rows."""
    n, h, wd, c = x.shape
    xp = jnp.pad(x, ((0, 0), (1, 1), (1, 1), (0, 0)),
                 constant_values=-jnp.inf)
    oh = (h + 2 - 3) // 2 + 1
    ow = (wd + 2 - 3) // 2 + 1
    taps = [xp[:, i:i + (oh - 1) * 2 + 1:2, j:j + (ow - 1) * 2 + 1:2, :]
            for i in range(3) for j in range(3)]
    m = n * oh * ow
    p = jnp.stack(taps, axis=0).reshape(9, m, c)
    tm = _row_tile(m, 9 * c, budget=4 << 20)
    mp = _ceil_to(m, tm)
    pp = jnp.pad(p, ((0, 0), (0, mp - m), (0, 0)))
    out = pl.pallas_call(
        _max_kernel,
        out_shape=jax.ShapeDtypeStruct((mp, c), jnp.float32),
        grid=(mp // tm,),
        in_specs=[pl.BlockSpec((9, tm, c), lambda i: (0, i, 0))],
        out_specs=pl.BlockSpec((tm, c), lambda i: (i, 0)),
        compiler_params=pltpu.CompilerParams(
            dimension_semantics=("parallel",)),
    )(pp)
    return out[:m].reshape(n, oh, ow, c)


# ----------------------------------------------------------------------------
# Layer helpers (JAX glue around the Pallas kernels)
# ----------------------------------------------------------------------------
_SMALL_COUT = 16


def bn_scale_shift(bn, eps=1e-5):
    # TODO(synk): PyTorch default (train-mode) BatchNorm uses batch statistics;
    # here BN is the inference (running-stats) affine form.
    scale = bn['gamma'] / jnp.sqrt(bn['var'] + eps)
    shift = bn['beta'] - bn['mean'] * scale
    return scale, shift


def conv2d(x, w, *, bias=None, bn=None, stride=(1, 1),
           padding=((0, 0), (0, 0)), relu=False):
    """x: (N,H,W,Cin) NHWC; w: (Cout,Cin,KH,KW) (PyTorch layout)."""
    cout, cin, kh, kw = w.shape
    n, h, wd, _ = x.shape
    sh, sw = stride
    if bn is not None:
        scale, shift = bn_scale_shift(bn)
        if bias is not None:
            shift = shift + bias * scale
    else:
        scale = jnp.ones((cout,), jnp.float32)
        shift = bias if bias is not None else jnp.zeros((cout,), jnp.float32)
    # TODO(synk): im2col is still materialised in HBM (in bf16); folding the
    # kh*kw taps into the matmul K grid axis would remove the remaining
    # 9x / 49x activation blow-up for the 3x3 / 7x7 convolutions.
    xb = x.astype(jnp.bfloat16)
    xp = jnp.pad(xb, ((0, 0), padding[0], padding[1], (0, 0)))
    hp = h + padding[0][0] + padding[0][1]
    wp = wd + padding[1][0] + padding[1][1]
    oh = (hp - kh) // sh + 1
    ow = (wp - kw) // sw + 1
    taps = [xp[:, i:i + (oh - 1) * sh + 1:sh, j:j + (ow - 1) * sw + 1:sw, :]
            for i in range(kh) for j in range(kw)]
    m = n * oh * ow
    k = kh * kw * cin
    if cout <= _SMALL_COUT:
        # Lane-dense transposed matmul: out^T = (scale * W^T) @ X^T + shift,
        # so the spatial dim sits in the 128-lane axis (no width-1 stores).
        xt = jnp.concatenate(
            [jnp.transpose(t, (3, 0, 1, 2)).reshape(cin, m) for t in taps],
            axis=0)                                              # (K, M)
        wt = jnp.transpose(w, (0, 2, 3, 1)).reshape(cout, k) * scale[:, None]
        out_t = matmul_small(wt, xt, shift, relu=relu)           # (Cout, M)
        out = jnp.transpose(out_t.reshape(cout, n, oh, ow), (1, 2, 3, 0))
    else:
        xm = jnp.concatenate(taps, axis=-1).reshape(m, k)
        wm = jnp.transpose(w, (2, 3, 1, 0)).reshape(k, cout) * scale[None, :]
        out = matmul_shift(xm, wm, shift, relu=relu).reshape(n, oh, ow, cout)
    return out


def conv_transpose2x2(x, p):
    """ConvTranspose2d(k=2, s=2); only used on num_classes-channel maps."""
    w, b = p['w'], p['b']                        # w: (Cin, Cout, 2, 2)
    n, h, wd, cin = x.shape
    _, cout, kh, kw = w.shape
    a = jnp.transpose(w, (2, 3, 1, 0)).reshape(kh * kw * cout, cin)
    xt = jnp.transpose(x.reshape(n * h * wd, cin), (1, 0))       # (Cin, M)
    shift = jnp.tile(b, kh * kw)
    out_t = matmul_small(a, xt, shift, relu=False)               # (4*Cout, M)
    out_t = out_t.reshape(kh, kw, cout, n, h, wd)
    out = jnp.transpose(out_t, (3, 4, 0, 5, 1, 2))
    return out.reshape(n, h * kh, wd * kw, cout)


# ----------------------------------------------------------------------------
# Parameter construction (deterministic synthetic weights)
# ----------------------------------------------------------------------------
class KeyGen:
    def __init__(self, seed=0):
        self._key = jax.random.PRNGKey(seed)
        self._i = 0

    def __call__(self):
        self._i += 1
        return jax.random.fold_in(self._key, self._i)


def make_conv(kg, cout, cin, kh, kw, bias=False):
    fan_in = cin * kh * kw
    w = jax.random.normal(kg(), (cout, cin, kh, kw), jnp.float32) * \
        (0.5 * math.sqrt(2.0 / fan_in))
    b = (jax.random.normal(kg(), (cout,), jnp.float32) * 0.01) if bias else None
    return {'w': w, 'b': b}


def make_bn(kg, c):
    return {
        'gamma': 1.0 + 0.1 * jax.random.normal(kg(), (c,), jnp.float32),
        'beta': 0.05 * jax.random.normal(kg(), (c,), jnp.float32),
        'mean': 0.05 * jax.random.normal(kg(), (c,), jnp.float32),
        'var': jax.random.uniform(kg(), (c,), jnp.float32, 0.8, 1.2),
    }


def make_bottleneck(kg, inplanes, planes, stride):
    p = dict(
        stride=stride,
        conv1=make_conv(kg, planes, inplanes, 1, 1), bn1=make_bn(kg, planes),
        conv2=make_conv(kg, planes, planes, 3, 3), bn2=make_bn(kg, planes),
        conv3=make_conv(kg, planes * 4, planes, 1, 1), bn3=make_bn(kg, planes * 4),
    )
    if stride != 1 or inplanes != planes * 4:
        p['downsample'] = dict(conv=make_conv(kg, planes * 4, inplanes, 1, 1),
                               bn=make_bn(kg, planes * 4))
    return p


def make_layer(kg, inplanes, planes, blocks, stride):
    layer = [make_bottleneck(kg, inplanes, planes, stride)]
    inplanes = planes * 4
    for _ in range(1, blocks):
        layer.append(make_bottleneck(kg, inplanes, planes, 1))
    return layer, inplanes


def make_gcn(kg, inplanes, planes, ks=7):
    return {
        'ks': ks,
        'l1': make_conv(kg, planes, inplanes, ks, 1, bias=True),
        'l2': make_conv(kg, planes, planes, 1, ks, bias=True),
        'r1': make_conv(kg, planes, inplanes, 1, ks, bias=True),
        'r2': make_conv(kg, planes, planes, ks, 1, bias=True),
    }


def make_refine(kg, planes):
    return {
        'bn': make_bn(kg, planes),
        'conv1': make_conv(kg, planes, planes, 3, 3, bias=True),
        'conv2': make_conv(kg, planes, planes, 3, 3, bias=True),
    }


def make_dconv(kg, c):
    fan = c * 4
    return {'w': jax.random.normal(kg(), (c, c, 2, 2), jnp.float32) *
                 math.sqrt(1.0 / fan),
            'b': 0.01 * jax.random.normal(kg(), (c,), jnp.float32)}


def make_lkm_params(seed=0, num_classes=1):
    kg = KeyGen(seed)
    p = {'conv1': make_conv(kg, 64, 3, 7, 7), 'bn0': make_bn(kg, 64)}
    inplanes = 64
    # ResNet-152 = Bottleneck layers [3, 8, 36, 3]
    p['layer1'], inplanes = make_layer(kg, inplanes, 64, 3, 1)
    p['layer2'], inplanes = make_layer(kg, inplanes, 128, 8, 2)
    p['layer3'], inplanes = make_layer(kg, inplanes, 256, 36, 2)
    p['layer4'], inplanes = make_layer(kg, inplanes, 512, 3, 2)
    p['gcn1'] = make_gcn(kg, 2048, num_classes)
    p['gcn2'] = make_gcn(kg, 1024, num_classes)
    p['gcn3'] = make_gcn(kg, 512, num_classes)
    p['gcn4'] = make_gcn(kg, 256, num_classes)
    for i in range(1, 11):
        p[f'refine{i}'] = make_refine(kg, num_classes)
    for i in range(1, 6):
        p[f'dconv{i}'] = make_dconv(kg, num_classes)
    return p


# ----------------------------------------------------------------------------
# Module forwards
# ----------------------------------------------------------------------------
def bottleneck_fwd(p, x):
    s = p['stride']
    out = conv2d(x, p['conv1']['w'], bn=p['bn1'], relu=True)
    out = conv2d(out, p['conv2']['w'], bn=p['bn2'], stride=(s, s),
                 padding=((1, 1), (1, 1)), relu=True)
    out = conv2d(out, p['conv3']['w'], bn=p['bn3'], relu=False)
    if 'downsample' in p:
        identity = conv2d(x, p['downsample']['conv']['w'],
                          bn=p['downsample']['bn'], stride=(s, s), relu=False)
    else:
        identity = x
    return add_op(out, identity, relu=True)           # relu(out + identity)


def layer_fwd(blocks, x):
    for blk in blocks:
        x = bottleneck_fwd(blk, x)
    return x


def gcn_fwd(p, x):
    pad = p['ks'] // 2
    xl = conv2d(x, p['l1']['w'], bias=p['l1']['b'], padding=((pad, pad), (0, 0)))
    xl = conv2d(xl, p['l2']['w'], bias=p['l2']['b'], padding=((0, 0), (pad, pad)))
    xr = conv2d(x, p['r1']['w'], bias=p['r1']['b'], padding=((0, 0), (pad, pad)))
    xr = conv2d(xr, p['r2']['w'], bias=p['r2']['b'], padding=((pad, pad), (0, 0)))
    return add_op(xl, xr, relu=False)                 # x_l + x_r


def refine_fwd(p, x):
    # TODO(synk): the three decoder micro-ops could be fused into one kernel
    # (needs 3x3 halo handling inside the kernel); kept as three lane-dense calls.
    scale, shift = bn_scale_shift(p['bn'])
    h = affine_op(x, scale, shift, relu=True)                         # relu(bn(x))
    h = conv2d(h, p['conv1']['w'], bias=p['conv1']['b'], padding=((1, 1), (1, 1)))
    h = conv2d(h, p['conv2']['w'], bias=p['conv2']['b'], padding=((1, 1), (1, 1)))
    return add_op(x, h, relu=False)                                   # x + h


def lkm_forward(p, x_nchw):
    # Mirrors LKM.forward with is_dconv=True (the default / deconv branch).
    # TODO(synk): is_dconv=False branch (F.upsample_bilinear) not implemented.
    x = jnp.transpose(x_nchw, (0, 2, 3, 1)).astype(jnp.float32)       # -> NHWC
    x = conv2d(x, p['conv1']['w'], bn=p['bn0'], stride=(2, 2),
               padding=((3, 3), (3, 3)), relu=True)                   # conv_x
    x = maxpool_3x3_s2(x)                                             # pool_x
    fm1 = layer_fwd(p['layer1'], x)
    fm2 = layer_fwd(p['layer2'], fm1)
    fm3 = layer_fwd(p['layer3'], fm2)
    fm4 = layer_fwd(p['layer4'], fm3)
    gcfm4 = refine_fwd(p['refine1'], gcn_fwd(p['gcn1'], fm4))
    gcfm3 = refine_fwd(p['refine2'], gcn_fwd(p['gcn2'], fm3))
    gcfm2 = refine_fwd(p['refine3'], gcn_fwd(p['gcn3'], fm2))
    gcfm1 = refine_fwd(p['refine4'], gcn_fwd(p['gcn4'], fm1))
    fs4 = refine_fwd(p['refine6'],
                     add_op(conv_transpose2x2(gcfm4, p['dconv5']), gcfm3))
    fs3 = refine_fwd(p['refine7'],
                     add_op(conv_transpose2x2(fs4, p['dconv4']), gcfm2))
    fs2 = refine_fwd(p['refine8'],
                     add_op(conv_transpose2x2(fs3, p['dconv3']), gcfm1))
    fs1 = refine_fwd(p['refine9'], conv_transpose2x2(fs2, p['dconv2']))
    out = refine_fwd(p['refine10'], conv_transpose2x2(fs1, p['dconv1']))
    out = jnp.transpose(out, (0, 3, 1, 2))                            # -> NCHW
    if out.shape[1] == 1:                                             # squeeze(dim=1)
        out = jnp.squeeze(out, axis=1)
    return out


# ----------------------------------------------------------------------------
if __name__ == "__main__":
    # Spatial size must be a multiple of 32 so the deconv pyramid lines up with
    # the backbone feature maps (ResNet downsamples by 32).
    x = jax.random.normal(jax.random.PRNGKey(0), (2, 3, 64, 64), jnp.float32)
    params = make_lkm_params(seed=0, num_classes=1)
    out = lkm_forward(params, x)
    out = jax.block_until_ready(out)
    assert out.shape == (2, 64, 64), out.shape
    assert bool(jnp.all(jnp.isfinite(out)))
    print("KERNEL_OK")
</pallas_src>

<mosaic_0001>
module attributes {stable_mosaic.version = 11 : i64} {
  func.func @_mm_kernel(%arg0: i32, %arg1: i32, %arg2: i32, %arg3: memref<512x256xbf16, #tpu.memory_space<vmem>>, %arg4: memref<256x128xbf16, #tpu.memory_space<vmem>>, %arg5: memref<1x128xf32, #tpu.memory_space<vmem>>, %arg6: memref<512x128xf32, #tpu.memory_space<vmem>>, %arg7: memref<512x128xf32, #tpu.memory_space<vmem>>) attributes {dimension_semantics = [#tpu.dimension_semantics<parallel>, #tpu.dimension_semantics<parallel>, #tpu.dimension_semantics<arbitrary>], iteration_bounds = array<i64: 4, 1, 1>, scalar_prefetch = 0 : i64, scratch_operands = 1 : i64, tpu.core_type = #tpu.core_type<tc>, window_params = [{transform_indices = @transform_0, window_bounds = array<i64: 512, 256>}, {transform_indices = @transform_1, window_bounds = array<i64: 256, 128>}, {transform_indices = @transform_2, window_bounds = array<i64: 1, 128>}, {transform_indices = @transform_3, window_bounds = array<i64: 512, 128>}]} {
    %c0_i32 = arith.constant 0 : i32
    %0 = arith.cmpi eq, %arg2, %c0_i32 : i32
    %1 = arith.extui %0 : i1 to i32
    %c0_i32_0 = arith.constant 0 : i32
    %2 = arith.cmpi ne, %1, %c0_i32_0 : i32
    scf.if %2 {
      %cst_10 = arith.constant 0.000000e+00 : f32
      %12 = vector.broadcast %cst_10 : f32 to vector<512x128xf32>
      %c0_11 = arith.constant 0 : index
      %c0_12 = arith.constant 0 : index
      %13 = vector.load %arg7[%c0_11, %c0_12] : memref<512x128xf32, #tpu.memory_space<vmem>>, vector<512x128xf32>
      tpu.vector_store %arg7[%c0_11, %c0_12], %12 {strides = array<i32>} : memref<512x128xf32, #tpu.memory_space<vmem>>, vector<512x128xf32>,
    } else {
    }
    %c0 = arith.constant 0 : index
    %c0_1 = arith.constant 0 : index
    %3 = vector.load %arg7[%c0, %c0_1] : memref<512x128xf32, #tpu.memory_space<vmem>>, vector<512x128xf32>
    %c0_2 = arith.constant 0 : index
    %c0_3 = arith.constant 0 : index
    %4 = vector.load %arg3[%c0_2, %c0_3] : memref<512x256xbf16, #tpu.memory_space<vmem>>, vector<512x256xbf16>
    %c0_4 = arith.constant 0 : index
    %c0_5 = arith.constant 0 : index
    %5 = vector.load %arg4[%c0_4, %c0_5] : memref<256x128xbf16, #tpu.memory_space<vmem>>, vector<256x128xbf16>
    %cst = arith.constant dense<0.000000e+00> : vector<512x128xf32>
    %6 = tpu.matmul %4, %5, %cst {dimension_numbers = #tpu.dot_dimension_numbers<[1], [0], [0], [1], [0, 0, 1, 1], [], []>} : vector<512x256xbf16>, vector<256x128xbf16>, vector<512x128xf32> -> vector<512x128xf32>
    %7 = arith.addf %3, %6 : vector<512x128xf32>
    %c0_6 = arith.constant 0 : index
    %c0_7 = arith.constant 0 : index
    %8 = vector.load %arg7[%c0_6, %c0_7] : memref<512x128xf32, #tpu.memory_space<vmem>>, vector<512x128xf32>
    tpu.vector_store %arg7[%c0_6, %c0_7], %7 {strides = array<i32>} : memref<512x128xf32, #tpu.memory_space<vmem>>, vector<512x128xf32>,
    %c0_i32_8 = arith.constant 0 : i32
    %9 = arith.cmpi eq, %arg2, %c0_i32_8 : i32
    %10 = arith.extui %9 : i1 to i32
    %c0_i32_9 = arith.constant 0 : i32
    %11 = arith.cmpi ne, %10, %c0_i32_9 : i32
    scf.if %11 {
      %c0_10 = arith.constant 0 : index
      %c0_11 = arith.constant 0 : index
      %12 = vector.load %arg7[%c0_10, %c0_11] : memref<512x128xf32, #tpu.memory_space<vmem>>, vector<512x128xf32>
      %c0_12 = arith.constant 0 : index
      %c0_13 = arith.constant 0 : index
      %13 = vector.load %arg5[%c0_12, %c0_13] : memref<1x128xf32, #tpu.memory_space<vmem>>, vector<1x128xf32>
      %14 = vector.broadcast %13 : vector<1x128xf32> to vector<512x128xf32>
      %15 = arith.addf %12, %14 : vector<512x128xf32>
      %cst_14 = arith.constant 0.000000e+00 : f32
      %16 = vector.broadcast %cst_14 : f32 to vector<512x128xf32>
      %17 = arith.maximumf %15, %16 : vector<512x128xf32>
      %c0_15 = arith.constant 0 : index
      %c0_16 = arith.constant 0 : index
      %18 = vector.load %arg6[%c0_15, %c0_16] : memref<512x128xf32, #tpu.memory_space<vmem>>, vector<512x128xf32>
      tpu.vector_store %arg6[%c0_15, %c0_16], %17 {strides = array<i32>} : memref<512x128xf32, #tpu.memory_space<vmem>>, vector<512x128xf32>,
    } else {
    }
    return
  }
  func.func @transform_0(%arg0: i32, %arg1: i32, %arg2: i32) -> (i32, i32) {
    %c0_i32 = arith.constant 0 : i32
    return %arg0, %arg2 : i32, i32
  }
  func.func @transform_1(%arg0: i32, %arg1: i32, %arg2: i32) -> (i32, i32) {
    %c0_i32 = arith.constant 0 : i32
    return %arg2, %arg1 : i32, i32
  }
  func.func @transform_2(%arg0: i32, %arg1: i32, %arg2: i32) -> (i32, i32) {
    %c0_i32 = arith.constant 0 : i32
    %c0_i32_0 = arith.constant 0 : i32
    return %c0_i32, %arg1 : i32, i32
  }
  func.func @transform_3(%arg0: i32, %arg1: i32, %arg2: i32) -> (i32, i32) {
    %c0_i32 = arith.constant 0 : i32
    return %arg0, %arg1 : i32, i32
  }
}

</mosaic_0001>

<bundles_post_ra>
// kernel: matmul_shift.1
= control target key start
LH: loop header
LB: loop body
LE: loop exit
PB: predicated region body
PF: predicated region fallthrough
CT: control target
= control target key end

     0   :  { %s2019_s12 = smov 0   ;;  %s2021_s13 = smov 0   ;;  %s2340_s0 = inlined_call_operand.vmem [shape: bf16[2048,256], index: 0, kind: input, shape index: {}]   ;;  %s2341_s1 = inlined_call_operand.vmem [shape: bf16[256,128], index: 1, kind: input, shape index: {}]   ;;  %s2342_s2 = inlined_call_operand.vmem [shape: f32[1,128], index: 2, kind: input, shape index: {}]   ;;  %s2343_s3 = inlined_call_operand.vmem [shape: f32[2048,128], index: 3, kind: output, shape index: {}]  }
   0x1   :  { %s2023_s14 = smov 0  }
   0x2 LB: > { %s32_s15 = sadd.s32 1, %s1992_s13  ;;  %p1715_p0 = scmp.ge.s32.totalorder %s1996_s14, 1  ;;  %s1996_s14 = sphi %s2023_s14, %s13_s14   ;;  %s1992_s13 = sphi %s2021_s13, %s2345_s13   ;;  %s1988_s12 = sphi %s2019_s12, %s2344_s12  }
   0x3   : > { %p34_p1 = scmp.ge.s32.totalorder %s32_s15, 4  ;;  %p191_p2 = scmp.lt.s32.totalorder %s1996_s14, 5 }
   0x5   : > { %s2347_s15 = smov (%p34_p1, %s32_s15), 0  ;;  %p192_p3 = pnand %p1715_p0, %p191_p2 }
   0x6   : > { %s1716_s18 = sshll.u32 (!%p192_p3), %s1988_s12, 6 }
   0x7   : > { %195 = sbr.rel (%p192_p3) target bundleno = 399 (0x18f), region = 32  ;;  %p236_p4 = scmp.lt.s32.totalorder (!%p192_p3), %s1716_s18, 255 }
   0xc   : > { %v1862_v0 = vld [vmem:[%s2341_s1 + $0x38] sm:$0xff]   ;;  %v1998_v1 = vmov 0   ;;  %v1863_v2 = vld [vmem:[%s2341_s1 + $0x30] sm:$0xff]   ;;  %v1864_v3 = vld [vmem:[%s2341_s1 + $0x28] sm:$0xff]   ;;  %s2349_s18 = smov (!%p236_p4, %s1716_s18), 255 }
   0xd   : > { %912 = vmatprep.subr.bf16.mxu0 %v1998_v1  ;;  %1805 = vmatprep.subr.bf16.mxu1 %v1998_v1  ;;  %v1865_v4 = vld [vmem:[%s2341_s1 + $0x20] sm:$0xff]   ;;  %s1804_s25 = sshll.u32 %s2349_s18, 3  ;;  %v1866_v5 = vld [vmem:[%s2341_s1 + $0x18] sm:$0xff]   ;;  %v1867_v7 = vld [vmem:[%s2341_s1 + $0x10] sm:$0xff]  }
   0xe   : > { %913 = vmatpush1.bf16.msra.mxu0 %v1862_v0  ;;  %1821 = vmatpush1.bf16.msra.mxu1 %v1862_v0  ;;  %s2068_s30 = scalar_lea.vmem %s2340_s0, %s1804_s25  ;;  %v1868_v9 = vld [vmem:[%s2341_s1 + $0x8] sm:$0xff]   ;;  %v1869_v10 = vld [vmem:[%s2341_s1] sm:$0xff]   ;;  %v1870_v11 = vld [vmem:[%s2341_s1 + $0x78] sm:$0xff]   ;;  %s2203_s9 = scalar_lea.vmem %s2343_s3, %s1804_s25 }
   0xf   : > { %914 = vmatprep.subr.bf16.mxu0 %v1998_v1  ;;  %1806 = vmatprep.subr.bf16.mxu1 %v1998_v1  ;;  %v1880_v6 = vld [vmem:[%s2068_s30 + $0x4] ss:$8 sps:$4 sm:$0xff]   ;;  %v1871_v12 = vld [vmem:[%s2341_s1 + $0x70] sm:$0xff]   ;;  %v1874_v15 = vld [vmem:[%s2341_s1 + $0x58] sm:$0xff]  }
  0x10   : > { %v1883_v8 = vld [vmem:[%s2068_s30 + $0x104] ss:$8 sps:$4 sm:$0xff]   ;;  %944 = vmatprep.mubr.bf16.mxu0 %v1880_v6  ;;  %v1875_v16 = vld [vmem:[%s2341_s1 + $0x50] sm:$0xff]   ;;  %v1878_v19 = vld [vmem:[%s2068_s30] ss:$8 sps:$4 sm:$0xff]  }
  0x11   : > { %1072 = vmatprep.mubr.bf16.mxu1 %v1883_v8  ;;  %v1872_v13 = vld [vmem:[%s2341_s1 + $0x68] sm:$0xff]   ;;  %v1873_v14 = vld [vmem:[%s2341_s1 + $0x60] sm:$0xff]   ;;  %v1884_v21 = vld [vmem:[%s2068_s30 + $0x14] ss:$8 sps:$4 sm:$0xff]  }
  0x12   : > { %915 = vmatpush1.bf16.msra.mxu0 %v1863_v2  ;;  %1822 = vmatpush1.bf16.msra.mxu1 %v1863_v2  ;;  %v1876_v17 = vld [vmem:[%s2341_s1 + $0x48] sm:$0xff]   ;;  %v1877_v18 = vld [vmem:[%s2341_s1 + $0x40] sm:$0xff]   ;;  %v1886_v22 = vld [vmem:[%s2068_s30 + $0x114] ss:$8 sps:$4 sm:$0xff]  }
  0x13   : > { %916 = vmatprep.subr.bf16.mxu0 %v1998_v1  ;;  %1807 = vmatprep.subr.bf16.mxu1 %v1998_v1  ;;  %v1881_v20 = vld [vmem:[%s2068_s30 + $0x100] ss:$8 sps:$4 sm:$0xff]   ;;  %v1888_v23 = vld [vmem:[%s2068_s30 + $0x10] ss:$8 sps:$4 sm:$0xff]   ;;  %v1890_v25 = vld [vmem:[%s2068_s30 + $0x24] ss:$8 sps:$4 sm:$0xff]  }
  0x14   : > { %v1889_v24 = vld [vmem:[%s2068_s30 + $0x110] ss:$8 sps:$4 sm:$0xff]   ;;  %v1892_v26 = vld [vmem:[%s2068_s30 + $0x124] ss:$8 sps:$4 sm:$0xff]   ;;  %v1894_v27 = vld [vmem:[%s2068_s30 + $0x20] ss:$8 sps:$4 sm:$0xff]  }
  0x15   : > { %v1895_v28 = vld [vmem:[%s2068_s30 + $0x120] ss:$8 sps:$4 sm:$0xff]   ;;  %v1896_v29 = vld [vmem:[%s2068_s30 + $0x34] ss:$8 sps:$4 sm:$0xff]   ;;  %v1900_v31 = vld [vmem:[%s2068_s30 + $0x30] ss:$8 sps:$4 sm:$0xff]  }
  0x16   : > { %917 = vmatpush1.bf16.msra.mxu0 %v1864_v3  ;;  %1823 = vmatpush1.bf16.msra.mxu1 %v1864_v3  ;;  %v1898_v30 = vld [vmem:[%s2068_s30 + $0x134] ss:$8 sps:$4 sm:$0xff]   ;;  %v1901_v32 = vld [vmem:[%s2068_s30 + $0x130] ss:$8 sps:$4 sm:$0xff]   ;;  %v1902_v33 = vld [vmem:[%s2068_s30 + $0x44] ss:$8 sps:$4 sm:$0xff]  }
  0x17   : > { %918 = vmatprep.subr.bf16.mxu0 %v1998_v1  ;;  %1808 = vmatprep.subr.bf16.mxu1 %v1998_v1  ;;  %v1904_v34 = vld [vmem:[%s2068_s30 + $0x144] ss:$8 sps:$4 sm:$0xff]   ;;  %v1906_v35 = vld [vmem:[%s2068_s30 + $0x40] ss:$8 sps:$4 sm:$0xff]   ;;  %v1908_v37 = vld [vmem:[%s2068_s30 + $0x54] ss:$8 sps:$4 sm:$0xff]  }
  0x18   : > { %v1907_v36 = vld [vmem:[%s2068_s30 + $0x140] ss:$8 sps:$4 sm:$0xff]   ;;  %v1910_v38 = vld [vmem:[%s2068_s30 + $0x154] ss:$8 sps:$4 sm:$0xff]   ;;  %v1912_v39 = vld [vmem:[%s2068_s30 + $0x50] ss:$8 sps:$4 sm:$0xff]  }
  0x19   : > { %v1913_v40 = vld [vmem:[%s2068_s30 + $0x150] ss:$8 sps:$4 sm:$0xff]   ;;  %v1914_v41 = vld [vmem:[%s2068_s30 + $0x64] ss:$8 sps:$4 sm:$0xff]   ;;  %v1918_v43 = vld [vmem:[%s2068_s30 + $0x60] ss:$8 sps:$4 sm:$0xff]  }
  0x1a   : > { %919 = vmatpush1.bf16.msra.mxu0 %v1865_v4  ;;  %1824 = vmatpush1.bf16.msra.mxu1 %v1865_v4  ;;  %v1916_v42 = vld [vmem:[%s2068_s30 + $0x164] ss:$8 sps:$4 sm:$0xff]   ;;  %v1919_v44 = vld [vmem:[%s2068_s30 + $0x160] ss:$8 sps:$4 sm:$0xff]   ;;  %v1920_v45 = vld [vmem:[%s2068_s30 + $0x74] ss:$8 sps:$4 sm:$0xff]  }
  0x1b   : > { %920 = vmatprep.subr.bf16.mxu0 %v1998_v1  ;;  %1809 = vmatprep.subr.bf16.mxu1 %v1998_v1  ;;  %v1922_v46 = vld [vmem:[%s2068_s30 + $0x174] ss:$8 sps:$4 sm:$0xff]   ;;  %v1924_v47 = vld [vmem:[%s2068_s30 + $0x70] ss:$8 sps:$4 sm:$0xff]   ;;  %v1926_v49 = vld [vmem:[%s2068_s30 + $0x84] ss:$8 sps:$4 sm:$0xff]  }
  0x1c   : > { %v1925_v48 = vld [vmem:[%s2068_s30 + $0x170] ss:$8 sps:$4 sm:$0xff]   ;;  %v1928_v50 = vld [vmem:[%s2068_s30 + $0x184] ss:$8 sps:$4 sm:$0xff]   ;;  %v1930_v51 = vld [vmem:[%s2068_s30 + $0x80] ss:$8 sps:$4 sm:$0xff]  }
  0x1d   : > { %v1931_v52 = vld [vmem:[%s2068_s30 + $0x180] ss:$8 sps:$4 sm:$0xff]   ;;  %v1932_v53 = vld [vmem:[%s2068_s30 + $0x94] ss:$8 sps:$4 sm:$0xff]   ;;  %v1936_v55 = vld [vmem:[%s2068_s30 + $0x90] ss:$8 sps:$4 sm:$0xff]  }
  0x1e   : > { %921 = vmatpush1.bf16.msra.mxu0 %v1866_v5  ;;  %1825 = vmatpush1.bf16.msra.mxu1 %v1866_v5  ;;  %v1934_v54 = vld [vmem:[%s2068_s30 + $0x194] ss:$8 sps:$4 sm:$0xff]   ;;  %v1937_v56 = vld [vmem:[%s2068_s30 + $0x190] ss:$8 sps:$4 sm:$0xff]   ;;  %v1938_v57 = vld [vmem:[%s2068_s30 + $0xa4] ss:$8 sps:$4 sm:$0xff]  }
  0x1f   : > { %922 = vmatprep.subr.bf16.mxu0 %v1998_v1  ;;  %1810 = vmatprep.subr.bf16.mxu1 %v1998_v1  ;;  %v1940_v58 = vld [vmem:[%s2068_s30 + $0x1a4] ss:$8 sps:$4 sm:$0xff]   ;;  %v1942_v59 = vld [vmem:[%s2068_s30 + $0xa0] ss:$8 sps:$4 sm:$0xff]   ;;  %v1944_v61 = vld [vmem:[%s2068_s30 + $0xb4] ss:$8 sps:$4 sm:$0xff]  }
  0x20   : > { %v1943_v60 = vld [vmem:[%s2068_s30 + $0x1a0] ss:$8 sps:$4 sm:$0xff]   ;;  %v1946_v62 = vld [vmem:[%s2068_s30 + $0x1b4] ss:$8 sps:$4 sm:$0xff]   ;;  %v1948_v63 = vld [vmem:[%s2068_s30 + $0xb0] ss:$8 sps:$4 sm:$0xff]  }
  0x21   : > { %v1949_v0 = vld [vmem:[%s2068_s30 + $0x1b0] ss:$8 sps:$4 sm:$0xff]   ;;  %v1952_v2 = vld [vmem:[%s2068_s30 + $0x1c4] ss:$8 sps:$4 sm:$0xff]   ;;  %v1954_v3 = vld [vmem:[%s2068_s30 + $0xc0] ss:$8 sps:$4 sm:$0xff]  }
  0x22   : > { %923 = vmatpush1.bf16.msra.mxu0 %v1867_v7  ;;  %1826 = vmatpush1.bf16.msra.mxu1 %v1867_v7  ;;  %v1955_v4 = vld [vmem:[%s2068_s30 + $0x1c0] ss:$8 sps:$4 sm:$0xff]   ;;  %v1956_v5 = vld [vmem:[%s2068_s30 + $0xd4] ss:$8 sps:$4 sm:$0xff]   ;;  %v1960_v7 = vld [vmem:[%s2068_s30 + $0xd0] ss:$8 sps:$4 sm:$0xff]  }
  0x23   : > { %924 = vmatprep.subr.bf16.mxu0 %v1998_v1  ;;  %1811 = vmatprep.subr.bf16.mxu1 %v1998_v1  ;;  %v1958_v6 = vld [vmem:[%s2068_s30 + $0x1d4] ss:$8 sps:$4 sm:$0xff]   ;;  %v1961_v8 = vld [vmem:[%s2068_s30 + $0x1d0] ss:$8 sps:$4 sm:$0xff]  }
  0x26   : > { %925 = vmatpush1.bf16.msra.mxu0 %v1868_v9  ;;  %1827 = vmatpush1.bf16.msra.mxu1 %v1868_v9  ;;  %v1962_v9 = vld [vmem:[%s2068_s30 + $0xe4] ss:$8 sps:$4 sm:$0xff]  }
  0x27   : > { %926 = vmatprep.subr.bf16.mxu0 %v1998_v1  ;;  %1812 = vmatprep.subr.bf16.mxu1 %v1998_v1 }
  0x2a   : > { %927 = vmatpush1.bf16.msra.mxu0 %v1869_v10  ;;  %1828 = vmatpush1.bf16.msra.mxu1 %v1869_v10  ;;  %v1964_v10 = vld [vmem:[%s2068_s30 + $0x1e4] ss:$8 sps:$4 sm:$0xff]  }
  0x2b   : > { %928 = vmatprep.subr.bf16.mxu0 %v1998_v1  ;;  %1813 = vmatprep.subr.bf16.mxu1 %v1998_v1 }
  0x2e   : > { %929 = vmatpush2.bf16.msra.mxu0 %v1870_v11  ;;  %1829 = vmatpush2.bf16.msra.mxu1 %v1870_v11  ;;  %v1966_v11 = vld [vmem:[%s2068_s30 + $0xe0] ss:$8 sps:$4 sm:$0xff]  }
  0x2f   : > { %930 = vmatprep.subr.bf16.mxu0 %v1998_v1  ;;  %1814 = vmatprep.subr.bf16.mxu1 %v1998_v1 }
  0x32   : > { %931 = vmatpush2.bf16.msra.mxu0 %v1871_v12  ;;  %1830 = vmatpush2.bf16.msra.mxu1 %v1871_v12  ;;  %v1967_v12 = vld [vmem:[%s2068_s30 + $0x1e0] ss:$8 sps:$4 sm:$0xff]  }
  0x33   : > { %932 = vmatprep.subr.bf16.mxu0 %v1998_v1  ;;  %1815 = vmatprep.subr.bf16.mxu1 %v1998_v1 }
  0x36   : > { %933 = vmatpush2.bf16.msra.mxu0 %v1872_v13  ;;  %1831 = vmatpush2.bf16.msra.mxu1 %v1872_v13  ;;  %v1968_v13 = vld [vmem:[%s2068_s30 + $0xf4] ss:$8 sps:$4 sm:$0xff]  }
  0x37   : > { %934 = vmatprep.subr.bf16.mxu0 %v1998_v1  ;;  %1816 = vmatprep.subr.bf16.mxu1 %v1998_v1 }
  0x3a   : > { %935 = vmatpush2.bf16.msra.mxu0 %v1873_v14  ;;  %1832 = vmatpush2.bf16.msra.mxu1 %v1873_v14  ;;  %v1970_v14 = vld [vmem:[%s2068_s30 + $0x1f4] ss:$8 sps:$4 sm:$0xff]  }
  0x3b   : > { %936 = vmatprep.subr.bf16.mxu0 %v1998_v1  ;;  %1817 = vmatprep.subr.bf16.mxu1 %v1998_v1 }
  0x3e   : > { %937 = vmatpush2.bf16.msra.mxu0 %v1874_v15  ;;  %1833 = vmatpush2.bf16.msra.mxu1 %v1874_v15  ;;  %v1972_v15 = vld [vmem:[%s2068_s30 + $0xf0] ss:$8 sps:$4 sm:$0xff]  }
  0x3f   : > { %938 = vmatprep.subr.bf16.mxu0 %v1998_v1  ;;  %1818 = vmatprep.subr.bf16.mxu1 %v1998_v1 }
  0x42   : > { %939 = vmatpush2.bf16.msra.mxu0 %v1875_v16  ;;  %1834 = vmatpush2.bf16.msra.mxu1 %v1875_v16  ;;  %v1973_v16 = vld [vmem:[%s2068_s30 + $0x1f0] ss:$8 sps:$4 sm:$0xff]  }
  0x43   : > { %940 = vmatprep.subr.bf16.mxu0 %v1998_v1  ;;  %1819 = vmatprep.subr.bf16.mxu1 %v1998_v1 }
  0x46   : > { %941 = vmatpush2.bf16.msra.mxu0 %v1876_v17  ;;  %1835 = vmatpush2.bf16.msra.mxu1 %v1876_v17  ;;  %v2194_v17 = vld [vmem:[%s2342_s2] ss:$0 sm:$0xff] }
  0x47   : > { %942 = vmatprep.subr.bf16.mxu0 %v1998_v1  ;;  %1820 = vmatprep.subr.bf16.mxu1 %v1998_v1  ;;  %v1950_v1 = vld [vmem:[%s2068_s30 + $0xc4] ss:$8 sps:$4 sm:$0xff]  }
  0x4a   : > { %943 = vmatpush2.bf16.msra.mxu0 %v1877_v18  ;;  %1836 = vmatpush2.bf16.msra.mxu1 %v1877_v18 }
  0x4d   : > { %945 = vmatmul.mubr.bf16.vlgmr.msra.gmra.mxu0 %v1878_v19  ;;  %1073 = vmatmul.mubr.bf16.vlgmr.msra.gmra.mxu1 %v1881_v20 }
  0x4e   : > { %952 = vmatprep.mubr.bf16.mxu0 %v1884_v21  ;;  %1080 = vmatprep.mubr.bf16.mxu1 %v1886_v22 }
  0x55   : > { %953 = vmatmul.mubr.bf16.gmra.mxu0 %v1888_v23  ;;  %1081 = vmatmul.mubr.bf16.gmra.mxu1 %v1889_v24 }
  0x56   : > { %960 = vmatprep.mubr.bf16.mxu0 %v1890_v25  ;;  %1088 = vmatprep.mubr.bf16.mxu1 %v1892_v26 }
  0x5d   : > { %961 = vmatmul.mubr.bf16.gmra.mxu0 %v1894_v27  ;;  %1089 = vmatmul.mubr.bf16.gmra.mxu1 %v1895_v28 }
  0x5e   : > { %968 = vmatprep.mubr.bf16.mxu0 %v1896_v29  ;;  %1096 = vmatprep.mubr.bf16.mxu1 %v1898_v30 }
  0x65   : > { %969 = vmatmul.mubr.bf16.gmra.mxu0 %v1900_v31  ;;  %1097 = vmatmul.mubr.bf16.gmra.mxu1 %v1901_v32 }
  0x66   : > { %976 = vmatprep.mubr.bf16.mxu0 %v1902_v33  ;;  %1104 = vmatprep.mubr.bf16.mxu1 %v1904_v34 }
  0x6d   : > { %977 = vmatmul.mubr.bf16.gmra.mxu0 %v1906_v35  ;;  %1105 = vmatmul.mubr.bf16.gmra.mxu1 %v1907_v36 }
  0x6e   : > { %984 = vmatprep.mubr.bf16.mxu0 %v1908_v37  ;;  %1112 = vmatprep.mubr.bf16.mxu1 %v1910_v38 }
  0x75   : > { %985 = vmatmul.mubr.bf16.gmra.mxu0 %v1912_v39  ;;  %1113 = vmatmul.mubr.bf16.gmra.mxu1 %v1913_v40 }
  0x76   : > { %992 = vmatprep.mubr.bf16.mxu0 %v1914_v41  ;;  %1120 = vmatprep.mubr.bf16.mxu1 %v1916_v42 }
  0x7d   : > { %993 = vmatmul.mubr.bf16.gmra.mxu0 %v1918_v43  ;;  %1121 = vmatmul.mubr.bf16.gmra.mxu1 %v1919_v44 }
  0x7e   : > { %1000 = vmatprep.mubr.bf16.mxu0 %v1920_v45  ;;  %1128 = vmatprep.mubr.bf16.mxu1 %v1922_v46 }
  0x85   : > { %1001 = vmatmul.mubr.bf16.gmra.mxu0 %v1924_v47  ;;  %1129 = vmatmul.mubr.bf16.gmra.mxu1 %v1925_v48 }
  0x86   : > { %1008 = vmatprep.mubr.bf16.mxu0 %v1926_v49  ;;  %1136 = vmatprep.mubr.bf16.mxu1 %v1928_v50 }
  0x8d   : > { %1009 = vmatmul.mubr.bf16.gmra.mxu0 %v1930_v51  ;;  %1137 = vmatmul.mubr.bf16.gmra.mxu1 %v1931_v52 }
  0x8e   : > { %1016 = vmatprep.mubr.bf16.mxu0 %v1932_v53  ;;  %1144 = vmatprep.mubr.bf16.mxu1 %v1934_v54 }
  0x95   : > { %1017 = vmatmul.mubr.bf16.gmra.mxu0 %v1936_v55  ;;  %1145 = vmatmul.mubr.bf16.gmra.mxu1 %v1937_v56 }
  0x96   : > { %1024 = vmatprep.mubr.bf16.mxu0 %v1938_v57  ;;  %1152 = vmatprep.mubr.bf16.mxu1 %v1940_v58 }
  0x9d   : > { %1025 = vmatmul.mubr.bf16.gmra.mxu0 %v1942_v59  ;;  %1153 = vmatmul.mubr.bf16.gmra.mxu1 %v1943_v60 }
  0x9e   : > { %1032 = vmatprep.mubr.bf16.mxu0 %v1944_v61  ;;  %1160 = vmatprep.mubr.bf16.mxu1 %v1946_v62 }
  0xa5   : > { %1033 = vmatmul.mubr.bf16.gmra.mxu0 %v1948_v63  ;;  %1161 = vmatmul.mubr.bf16.gmra.mxu1 %v1949_v0 }
  0xa6   : > { %1040 = vmatprep.mubr.bf16.mxu0 %v1950_v1  ;;  %1168 = vmatprep.mubr.bf16.mxu1 %v1952_v2 }
  0xad   : > { %1041 = vmatmul.mubr.bf16.gmra.mxu0 %v1954_v3  ;;  %1169 = vmatmul.mubr.bf16.gmra.mxu1 %v1955_v4 }
  0xae   : > { %1048 = vmatprep.mubr.bf16.mxu0 %v1956_v5  ;;  %1176 = vmatprep.mubr.bf16.mxu1 %v1958_v6 }
  0xb5   : > { %1049 = vmatmul.mubr.bf16.gmra.mxu0 %v1960_v7  ;;  %1177 = vmatmul.mubr.bf16.gmra.mxu1 %v1961_v8 }
  0xb6   : > { %1056 = vmatprep.mubr.bf16.mxu0 %v1962_v9  ;;  %1184 = vmatprep.mubr.bf16.mxu1 %v1964_v10 }
  0xbd   : > { %1057 = vmatmul.mubr.bf16.gmra.mxu0 %v1966_v11  ;;  %1185 = vmatmul.mubr.bf16.gmra.mxu1 %v1967_v12 }
  0xbe   : > { %1064 = vmatprep.mubr.bf16.mxu0 %v1968_v13  ;;  %1192 = vmatprep.mubr.bf16.mxu1 %v1970_v14 }
  0xc5   : > { %1065 = vmatmul.mubr.bf16.gmra.mxu0 %v1972_v15  ;;  %1193 = vmatmul.mubr.bf16.gmra.mxu1 %v1973_v16 }
 0x10d   : > { %v946_v18 = vpop.f32.mrf.mxu0  ;;  %v1074_v19 = vpop.f32.mrf.mxu1 }
 0x10e   : > { %v1403_v20 = vadd.f32 %v2194_v17, %v946_v18  ;;  %v1435_v21 = vadd.f32 %v2194_v17, %v1074_v19 }
 0x10f   : > { %v948_v22 = vpop.f32.mrf.mxu0  ;;  %v1076_v23 = vpop.f32.mrf.mxu1 }
 0x110   : > { %v1467_v24 = vmax.f32 %v1403_v20, 0.0  ;;  %v1499_v25 = vmax.f32 %v1435_v21, 0.0 }
 0x111   : > { %v949_v26 = vpop.f32.mrf.mxu0  ;;  %v1077_v27 = vpop.f32.mrf.mxu1 }
 0x112   : > { %1531 = vst [vmem:[%s2203_s9] sm:$0xff] %v1467_v24  ;;  %1563 = vst [vmem:[%s2203_s9 + $0x100] sm:$0xff] %v1499_v25  ;;  %v1404_v28 = vadd.f32 %v2194_v17, %v949_v26  ;;  %v1436_v29 = vadd.f32 %v2194_v17, %v1077_v27 }
 0x113   : > { %v951_v30 = vpop.f32.mrf.mxu0  ;;  %v1079_v31 = vpop.f32.mrf.mxu1 }
 0x114   : > { %v1468_v32 = vmax.f32 %v1404_v28, 0.0  ;;  %v1500_v33 = vmax.f32 %v1436_v29, 0.0 }
 0x115   : > { %v954_v34 = vpop.f32.mrf.mxu0  ;;  %v1082_v35 = vpop.f32.mrf.mxu1 }
 0x116   : > { %1532 = vst [vmem:[%s2203_s9 + $0x8] sm:$0xff] %v1468_v32  ;;  %1564 = vst [vmem:[%s2203_s9 + $0x108] sm:$0xff] %v1500_v33  ;;  %v1405_v36 = vadd.f32 %v2194_v17, %v954_v34  ;;  %v1437_v37 = vadd.f32 %v2194_v17, %v1082_v35 }
 0x117   : > { %v956_v38 = vpop.f32.mrf.mxu0  ;;  %v1084_v39 = vpop.f32.mrf.mxu1 }
 0x118   : > { %v1469_v40 = vmax.f32 %v1405_v36, 0.0  ;;  %v1501_v41 = vmax.f32 %v1437_v37, 0.0 }
 0x119   : > { %v957_v42 = vpop.f32.mrf.mxu0  ;;  %v1085_v43 = vpop.f32.mrf.mxu1 }
 0x11a   : > { %1533 = vst [vmem:[%s2203_s9 + $0x10] sm:$0xff] %v1469_v40  ;;  %1565 = vst [vmem:[%s2203_s9 + $0x110] sm:$0xff] %v1501_v41  ;;  %v1406_v44 = vadd.f32 %v2194_v17, %v957_v42  ;;  %v1438_v45 = vadd.f32 %v2194_v17, %v1085_v43 }
 0x11b   : > { %v959_v46 = vpop.f32.mrf.mxu0  ;;  %v1087_v47 = vpop.f32.mrf.mxu1 }
 0x11c   : > { %v1470_v48 = vmax.f32 %v1406_v44, 0.0  ;;  %v1502_v49 = vmax.f32 %v1438_v45, 0.0 }
 0x11d   : > { %v962_v50 = vpop.f32.mrf.mxu0  ;;  %v1090_v51 = vpop.f32.mrf.mxu1 }
 0x11e   : > { %1534 = vst [vmem:[%s2203_s9 + $0x18] sm:$0xff] %v1470_v48  ;;  %1566 = vst [vmem:[%s2203_s9 + $0x118] sm:$0xff] %v1502_v49  ;;  %v1407_v52 = vadd.f32 %v2194_v17, %v962_v50  ;;  %v1439_v53 = vadd.f32 %v2194_v17, %v1090_v51 }
 0x11f   : > { %v964_v54 = vpop.f32.mrf.mxu0  ;;  %v1092_v55 = vpop.f32.mrf.mxu1 }
 0x120   : > { %v1471_v56 = vmax.f32 %v1407_v52, 0.0  ;;  %v1503_v57 = vmax.f32 %v1439_v53, 0.0 }
 0x121   : > { %v965_v58 = vpop.f32.mrf.mxu0  ;;  %v1093_v59 = vpop.f32.mrf.mxu1 }
 0x122   : > { %1535 = vst [vmem:[%s2203_s9 + $0x20] sm:$0xff] %v1471_v56  ;;  %1567 = vst [vmem:[%s2203_s9 + $0x120] sm:$0xff] %v1503_v57  ;;  %v1408_v60 = vadd.f32 %v2194_v17, %v965_v58  ;;  %v1440_v61 = vadd.f32 %v2194_v17, %v1093_v59 }
 0x123   : > { %v967_v62 = vpop.f32.mrf.mxu0  ;;  %v1095_v63 = vpop.f32.mrf.mxu1 }
 0x124   : > { %v1472_v0 = vmax.f32 %v1408_v60, 0.0  ;;  %v1504_v1 = vmax.f32 %v1440_v61, 0.0 }
 0x125   : > { %v970_v2 = vpop.f32.mrf.mxu0  ;;  %v1098_v3 = vpop.f32.mrf.mxu1 }
 0x126   : > { %1536 = vst [vmem:[%s2203_s9 + $0x28] sm:$0xff] %v1472_v0  ;;  %1568 = vst [vmem:[%s2203_s9 + $0x128] sm:$0xff] %v1504_v1  ;;  %v1409_v4 = vadd.f32 %v2194_v17, %v970_v2  ;;  %v1441_v5 = vadd.f32 %v2194_v17, %v1098_v3 }
 0x127   : > { %v972_v6 = vpop.f32.mrf.mxu0  ;;  %v1100_v7 = vpop.f32.mrf.mxu1 }
 0x128   : > { %v1473_v8 = vmax.f32 %v1409_v4, 0.0  ;;  %v1505_v9 = vmax.f32 %v1441_v5, 0.0 }
 0x129   : > { %v973_v10 = vpop.f32.mrf.mxu0  ;;  %v1101_v11 = vpop.f32.mrf.mxu1 }
 0x12a   : > { %1537 = vst [vmem:[%s2203_s9 + $0x30] sm:$0xff] %v1473_v8  ;;  %1569 = vst [vmem:[%s2203_s9 + $0x130] sm:$0xff] %v1505_v9  ;;  %v1410_v12 = vadd.f32 %v2194_v17, %v973_v10  ;;  %v1442_v13 = vadd.f32 %v2194_v17, %v1101_v11 }
 0x12b   : > { %v975_v14 = vpop.f32.mrf.mxu0  ;;  %v1103_v15 = vpop.f32.mrf.mxu1 }
 0x12c   : > { %v1474_v16 = vmax.f32 %v1410_v12, 0.0  ;;  %v1506_v18 = vmax.f32 %v1442_v13, 0.0 }
 0x12d   : > { %v978_v19 = vpop.f32.mrf.mxu0  ;;  %v1106_v20 = vpop.f32.mrf.mxu1 }
 0x12e   : > { %1538 = vst [vmem:[%s2203_s9 + $0x38] sm:$0xff] %v1474_v16  ;;  %1570 = vst [vmem:[%s2203_s9 + $0x138] sm:$0xff] %v1506_v18  ;;  %v1411_v21 = vadd.f32 %v2194_v17, %v978_v19  ;;  %v1443_v22 = vadd.f32 %v2194_v17, %v1106_v20 }
 0x12f   : > { %v980_v23 = vpop.f32.mrf.mxu0  ;;  %v1108_v24 = vpop.f32.mrf.mxu1 }
 0x130   : > { %v1475_v25 = vmax.f32 %v1411_v21, 0.0  ;;  %v1507_v26 = vmax.f32 %v1443_v22, 0.0 }
 0x131   : > { %v981_v27 = vpop.f32.mrf.mxu0  ;;  %v1109_v28 = vpop.f32.mrf.mxu1 }
 0x132   : > { %1539 = vst [vmem:[%s2203_s9 + $0x40] sm:$0xff] %v1475_v25  ;;  %1571 = vst [vmem:[%s2203_s9 + $0x140] sm:$0xff] %v1507_v26  ;;  %v1412_v29 = vadd.f32 %v2194_v17, %v981_v27  ;;  %v1444_v30 = vadd.f32 %v2194_v17, %v1109_v28 }
 0x133   : > { %v983_v31 = vpop.f32.mrf.mxu0  ;;  %v1111_v32 = vpop.f32.mrf.mxu1 }
 0x134   : > { %v1476_v33 = vmax.f32 %v1412_v29, 0.0  ;;  %v1508_v34 = vmax.f32 %v1444_v30, 0.0 }
 0x135   : > { %v986_v35 = vpop.f32.mrf.mxu0  ;;  %v1114_v36 = vpop.f32.mrf.mxu1 }
 0x136   : > { %1540 = vst [vmem:[%s2203_s9 + $0x48] sm:$0xff] %v1476_v33  ;;  %1572 = vst [vmem:[%s2203_s9 + $0x148] sm:$0xff] %v1508_v34  ;;  %v1413_v37 = vadd.f32 %v2194_v17, %v986_v35  ;;  %v1445_v38 = vadd.f32 %v2194_v17, %v1114_v36 }
 0x137   : > { %v988_v39 = vpop.f32.mrf.mxu0  ;;  %v1116_v40 = vpop.f32.mrf.mxu1 }
 0x138   : > { %v1477_v41 = vmax.f32 %v1413_v37, 0.0  ;;  %v1509_v42 = vmax.f32 %v1445_v38, 0.0 }
 0x139   : > { %v989_v43 = vpop.f32.mrf.mxu0  ;;  %v1117_v44 = vpop.f32.mrf.mxu1 }
 0x13a   : > { %1541 = vst [vmem:[%s2203_s9 + $0x50] sm:$0xff] %v1477_v41  ;;  %1573 = vst [vmem:[%s2203_s9 + $0x150] sm:$0xff] %v1509_v42  ;;  %v1414_v45 = vadd.f32 %v2194_v17, %v989_v43  ;;  %v1446_v46 = vadd.f32 %v2194_v17, %v1117_v44 }
 0x13b   : > { %v991_v47 = vpop.f32.mrf.mxu0  ;;  %v1119_v48 = vpop.f32.mrf.mxu1 }
 0x13c   : > { %v1478_v49 = vmax.f32 %v1414_v45, 0.0  ;;  %v1510_v50 = vmax.f32 %v1446_v46, 0.0 }
 0x13d   : > { %v994_v51 = vpop.f32.mrf.mxu0  ;;  %v1122_v52 = vpop.f32.mrf.mxu1 }
 0x13e   : > { %1542 = vst [vmem:[%s2203_s9 + $0x58] sm:$0xff] %v1478_v49  ;;  %1574 = vst [vmem:[%s2203_s9 + $0x158] sm:$0xff] %v1510_v50  ;;  %v1415_v53 = vadd.f32 %v2194_v17, %v994_v51  ;;  %v1447_v54 = vadd.f32 %v2194_v17, %v1122_v52 }
 0x13f   : > { %v996_v55 = vpop.f32.mrf.mxu0  ;;  %v1124_v56 = vpop.f32.mrf.mxu1 }
 0x140   : > { %v1479_v57 = vmax.f32 %v1415_v53, 0.0  ;;  %v1511_v58 = vmax.f32 %v1447_v54, 0.0 }
 0x141   : > { %v997_v59 = vpop.f32.mrf.mxu0  ;;  %v1125_v60 = vpop.f32.mrf.mxu1 }
 0x142   : > { %1543 = vst [vmem:[%s2203_s9 + $0x60] sm:$0xff] %v1479_v57  ;;  %1575 = vst [vmem:[%s2203_s9 + $0x160] sm:$0xff] %v1511_v58  ;;  %v1416_v61 = vadd.f32 %v2194_v17, %v997_v59  ;;  %v1448_v62 = vadd.f32 %v2194_v17, %v1125_v60 }
 0x143   : > { %v999_v63 = vpop.f32.mrf.mxu0  ;;  %v1127_v0 = vpop.f32.mrf.mxu1 }
 0x144   : > { %v1480_v1 = vmax.f32 %v1416_v61, 0.0  ;;  %v1512_v2 = vmax.f32 %v1448_v62, 0.0 }
 0x145   : > { %v1002_v3 = vpop.f32.mrf.mxu0  ;;  %v1130_v4 = vpop.f32.mrf.mxu1 }
 0x146   : > { %1544 = vst [vmem:[%s2203_s9 + $0x68] sm:$0xff] %v1480_v1  ;;  %1576 = vst [vmem:[%s2203_s9 + $0x168] sm:$0xff] %v1512_v2  ;;  %v1417_v5 = vadd.f32 %v2194_v17, %v1002_v3  ;;  %v1449_v6 = vadd.f32 %v2194_v17, %v1130_v4 }
 0x147   : > { %v1004_v7 = vpop.f32.mrf.mxu0  ;;  %v1132_v8 = vpop.f32.mrf.mxu1 }
 0x148   : > { %v1481_v9 = vmax.f32 %v1417_v5, 0.0  ;;  %v1513_v10 = vmax.f32 %v1449_v6, 0.0 }
 0x149   : > { %v1005_v11 = vpop.f32.mrf.mxu0  ;;  %v1133_v12 = vpop.f32.mrf.mxu1 }
 0x14a   : > { %1545 = vst [vmem:[%s2203_s9 + $0x70] sm:$0xff] %v1481_v9  ;;  %1577 = vst [vmem:[%s2203_s9 + $0x170] sm:$0xff] %v1513_v10  ;;  %v1418_v13 = vadd.f32 %v2194_v17, %v1005_v11  ;;  %v1450_v14 = vadd.f32 %v2194_v17, %v1133_v12 }
 0x14b   : > { %v1007_v15 = vpop.f32.mrf.mxu0  ;;  %v1135_v16 = vpop.f32.mrf.mxu1 }
 0x14c   : > { %v1482_v18 = vmax.f32 %v1418_v13, 0.0  ;;  %v1514_v19 = vmax.f32 %v1450_v14, 0.0 }
 0x14d   : > { %v1010_v20 = vpop.f32.mrf.mxu0  ;;  %v1138_v21 = vpop.f32.mrf.mxu1 }
 0x14e   : > { %1546 = vst [vmem:[%s2203_s9 + $0x78] sm:$0xff] %v1482_v18  ;;  %1578 = vst [vmem:[%s2203_s9 + $0x178] sm:$0xff] %v1514_v19  ;;  %v1419_v22 = vadd.f32 %v2194_v17, %v1010_v20  ;;  %v1451_v23 = vadd.f32 %v2194_v17, %v1138_v21 }
 0x14f   : > { %v1012_v24 = vpop.f32.mrf.mxu0  ;;  %v1140_v25 = vpop.f32.mrf.mxu1 }
 0x150   : > { %v1483_v26 = vmax.f32 %v1419_v22, 0.0  ;;  %v1515_v27 = vmax.f32 %v1451_v23, 0.0 }
 0x151   : > { %v1013_v28 = vpop.f32.mrf.mxu0  ;;  %v1141_v29 = vpop.f32.mrf.mxu1 }
 0x152   : > { %1547 = vst [vmem:[%s2203_s9 + $0x80] sm:$0xff] %v1483_v26  ;;  %1579 = vst [vmem:[%s2203_s9 + $0x180] sm:$0xff] %v1515_v27  ;;  %v1420_v30 = vadd.f32 %v2194_v17, %v1013_v28  ;;  %v1452_v31 = vadd.f32 %v2194_v17, %v1141_v29 }
 0x153   : > { %v1015_v32 = vpop.f32.mrf.mxu0  ;;  %v1143_v33 = vpop.f32.mrf.mxu1 }
 0x154   : > { %v1484_v34 = vmax.f32 %v1420_v30, 0.0  ;;  %v1516_v35 = vmax.f32 %v1452_v31, 0.0 }
 0x155   : > { %v1018_v36 = vpop.f32.mrf.mxu0  ;;  %v1146_v37 = vpop.f32.mrf.mxu1 }
 0x156   : > { %1548 = vst [vmem:[%s2203_s9 + $0x88] sm:$0xff] %v1484_v34  ;;  %1580 = vst [vmem:[%s2203_s9 + $0x188] sm:$0xff] %v1516_v35  ;;  %v1421_v38 = vadd.f32 %v2194_v17, %v1018_v36  ;;  %v1453_v39 = vadd.f32 %v2194_v17, %v1146_v37 }
 0x157   : > { %v1020_v40 = vpop.f32.mrf.mxu0  ;;  %v1148_v41 = vpop.f32.mrf.mxu1 }
 0x158   : > { %v1485_v42 = vmax.f32 %v1421_v38, 0.0  ;;  %v1517_v43 = vmax.f32 %v1453_v39, 0.0 }
 0x159   : > { %v1021_v44 = vpop.f32.mrf.mxu0  ;;  %v1149_v45 = vpop.f32.mrf.mxu1 }
 0x15a   : > { %1549 = vst [vmem:[%s2203_s9 + $0x90] sm:$0xff] %v1485_v42  ;;  %1581 = vst [vmem:[%s2203_s9 + $0x190] sm:$0xff] %v1517_v43  ;;  %v1422_v46 = vadd.f32 %v2194_v17, %v1021_v44  ;;  %v1454_v47 = vadd.f32 %v2194_v17, %v1149_v45 }
 0x15b   : > { %v1023_v48 = vpop.f32.mrf.mxu0  ;;  %v1151_v49 = vpop.f32.mrf.mxu1 }
 0x15c   : > { %v1486_v50 = vmax.f32 %v1422_v46, 0.0  ;;  %v1518_v51 = vmax.f32 %v1454_v47, 0.0 }
 0x15d   : > { %v1026_v52 = vpop.f32.mrf.mxu0  ;;  %v1154_v53 = vpop.f32.mrf.mxu1 }
 0x15e   : > { %1550 = vst [vmem:[%s2203_s9 + $0x98] sm:$0xff] %v1486_v50  ;;  %1582 = vst [vmem:[%s2203_s9 + $0x198] sm:$0xff] %v1518_v51  ;;  %v1423_v54 = vadd.f32 %v2194_v17, %v1026_v52  ;;  %v1455_v55 = vadd.f32 %v2194_v17, %v1154_v53 }
 0x15f   : > { %v1028_v56 = vpop.f32.mrf.mxu0  ;;  %v1156_v57 = vpop.f32.mrf.mxu1 }
 0x160   : > { %v1487_v58 = vmax.f32 %v1423_v54, 0.0  ;;  %v1519_v59 = vmax.f32 %v1455_v55, 0.0 }
 0x161   : > { %v1029_v60 = vpop.f32.mrf.mxu0  ;;  %v1157_v61 = vpop.f32.mrf.mxu1 }
 0x162   : > { %1551 = vst [vmem:[%s2203_s9 + $0xa0] sm:$0xff] %v1487_v58  ;;  %1583 = vst [vmem:[%s2203_s9 + $0x1a0] sm:$0xff] %v1519_v59  ;;  %v1424_v62 = vadd.f32 %v2194_v17, %v1029_v60  ;;  %v1456_v63 = vadd.f32 %v2194_v17, %v1157_v61 }
 0x163   : > { %v1031_v0 = vpop.f32.mrf.mxu0  ;;  %v1159_v1 = vpop.f32.mrf.mxu1 }
 0x164   : > { %v1488_v2 = vmax.f32 %v1424_v62, 0.0  ;;  %v1520_v3 = vmax.f32 %v1456_v63, 0.0 }
 0x165   : > { %v1034_v4 = vpop.f32.mrf.mxu0  ;;  %v1162_v5 = vpop.f32.mrf.mxu1 }
 0x166   : > { %1552 = vst [vmem:[%s2203_s9 + $0xa8] sm:$0xff] %v1488_v2  ;;  %1584 = vst [vmem:[%s2203_s9 + $0x1a8] sm:$0xff] %v1520_v3  ;;  %v1425_v6 = vadd.f32 %v2194_v17, %v1034_v4  ;;  %v1457_v7 = vadd.f32 %v2194_v17, %v1162_v5 }
 0x167   : > { %v1036_v8 = vpop.f32.mrf.mxu0  ;;  %v1164_v9 = vpop.f32.mrf.mxu1 }
 0x168   : > { %v1489_v10 = vmax.f32 %v1425_v6, 0.0  ;;  %v1521_v11 = vmax.f32 %v1457_v7, 0.0 }
 0x169   : > { %v1037_v12 = vpop.f32.mrf.mxu0  ;;  %v1165_v13 = vpop.f32.mrf.mxu1 }
 0x16a   : > { %1553 = vst [vmem:[%s2203_s9 + $0xb0] sm:$0xff] %v1489_v10  ;;  %1585 = vst [vmem:[%s2203_s9 + $0x1b0] sm:$0xff] %v1521_v11  ;;  %v1426_v14 = vadd.f32 %v2194_v17, %v1037_v12  ;;  %v1458_v15 = vadd.f32 %v2194_v17, %v1165_v13 }
 0x16b   : > { %v1039_v16 = vpop.f32.mrf.mxu0  ;;  %v1167_v18 = vpop.f32.mrf.mxu1 }
 0x16c   : > { %v1490_v19 = vmax.f32 %v1426_v14, 0.0  ;;  %v1522_v20 = vmax.f32 %v1458_v15, 0.0 }
 0x16d   : > { %v1042_v21 = vpop.f32.mrf.mxu0  ;;  %v1170_v22 = vpop.f32.mrf.mxu1 }
 0x16e   : > { %1554 = vst [vmem:[%s2203_s9 + $0xb8] sm:$0xff] %v1490_v19  ;;  %1586 = vst [vmem:[%s2203_s9 + $0x1b8] sm:$0xff] %v1522_v20  ;;  %v1427_v23 = vadd.f32 %v2194_v17, %v1042_v21  ;;  %v1459_v24 = vadd.f32 %v2194_v17, %v1170_v22 }
 0x16f   : > { %v1044_v25 = vpop.f32.mrf.mxu0  ;;  %v1172_v26 = vpop.f32.mrf.mxu1 }
 0x170   : > { %v1491_v27 = vmax.f32 %v1427_v23, 0.0  ;;  %v1523_v28 = vmax.f32 %v1459_v24, 0.0 }
 0x171   : > { %v1045_v29 = vpop.f32.mrf.mxu0  ;;  %v1173_v30 = vpop.f32.mrf.mxu1 }
 0x172   : > { %1555 = vst [vmem:[%s2203_s9 + $0xc0] sm:$0xff] %v1491_v27  ;;  %1587 = vst [vmem:[%s2203_s9 + $0x1c0] sm:$0xff] %v1523_v28  ;;  %v1428_v31 = vadd.f32 %v2194_v17, %v1045_v29  ;;  %v1460_v32 = vadd.f32 %v2194_v17, %v1173_v30 }
 0x173   : > { %v1047_v33 = vpop.f32.mrf.mxu0  ;;  %v1175_v34 = vpop.f32.mrf.mxu1 }
 0x174   : > { %v1492_v35 = vmax.f32 %v1428_v31, 0.0  ;;  %v1524_v36 = vmax.f32 %v1460_v32, 0.0 }
 0x175   : > { %v1050_v37 = vpop.f32.mrf.mxu0  ;;  %v1178_v38 = vpop.f32.mrf.mxu1 }
 0x176   : > { %1556 = vst [vmem:[%s2203_s9 + $0xc8] sm:$0xff] %v1492_v35  ;;  %1588 = vst [vmem:[%s2203_s9 + $0x1c8] sm:$0xff] %v1524_v36  ;;  %v1429_v39 = vadd.f32 %v2194_v17, %v1050_v37  ;;  %v1461_v40 = vadd.f32 %v2194_v17, %v1178_v38 }
 0x177   : > { %v1052_v41 = vpop.f32.mrf.mxu0  ;;  %v1180_v42 = vpop.f32.mrf.mxu1 }
 0x178   : > { %v1493_v43 = vmax.f32 %v1429_v39, 0.0  ;;  %v1525_v44 = vmax.f32 %v1461_v40, 0.0 }
 0x179   : > { %v1053_v45 = vpop.f32.mrf.mxu0  ;;  %v1181_v46 = vpop.f32.mrf.mxu1 }
 0x17a   : > { %1557 = vst [vmem:[%s2203_s9 + $0xd0] sm:$0xff] %v1493_v43  ;;  %1589 = vst [vmem:[%s2203_s9 + $0x1d0] sm:$0xff] %v1525_v44  ;;  %v1430_v47 = vadd.f32 %v2194_v17, %v1053_v45  ;;  %v1462_v48 = vadd.f32 %v2194_v17, %v1181_v46 }
 0x17b   : > { %v1055_v49 = vpop.f32.mrf.mxu0  ;;  %v1183_v50 = vpop.f32.mrf.mxu1 }
 0x17c   : > { %v1494_v51 = vmax.f32 %v1430_v47, 0.0  ;;  %v1526_v52 = vmax.f32 %v1462_v48, 0.0 }
 0x17d   : > { %v1058_v53 = vpop.f32.mrf.mxu0  ;;  %v1186_v54 = vpop.f32.mrf.mxu1 }
 0x17e   : > { %1558 = vst [vmem:[%s2203_s9 + $0xd8] sm:$0xff] %v1494_v51  ;;  %1590 = vst [vmem:[%s2203_s9 + $0x1d8] sm:$0xff] %v1526_v52  ;;  %v1431_v55 = vadd.f32 %v2194_v17, %v1058_v53  ;;  %v1463_v56 = vadd.f32 %v2194_v17, %v1186_v54 }
 0x17f   : > { %v1060_v57 = vpop.f32.mrf.mxu0  ;;  %v1188_v58 = vpop.f32.mrf.mxu1 }
 0x180   : > { %v1495_v59 = vmax.f32 %v1431_v55, 0.0  ;;  %v1527_v60 = vmax.f32 %v1463_v56, 0.0 }
 0x181   : > { %v1061_v61 = vpop.f32.mrf.mxu0  ;;  %v1189_v62 = vpop.f32.mrf.mxu1 }
 0x182   : > { %1559 = vst [vmem:[%s2203_s9 + $0xe0] sm:$0xff] %v1495_v59  ;;  %1591 = vst [vmem:[%s2203_s9 + $0x1e0] sm:$0xff] %v1527_v60  ;;  %v1432_v63 = vadd.f32 %v2194_v17, %v1061_v61  ;;  %v1464_v0 = vadd.f32 %v2194_v17, %v1189_v62 }
 0x183   : > { %v1063_v1 = vpop.f32.mrf.mxu0  ;;  %v1191_v2 = vpop.f32.mrf.mxu1 }
 0x184   : > { %v1496_v3 = vmax.f32 %v1432_v63, 0.0  ;;  %v1528_v4 = vmax.f32 %v1464_v0, 0.0 }
 0x185   : > { %v1066_v5 = vpop.f32.mrf.mxu0  ;;  %v1194_v6 = vpop.f32.mrf.mxu1 }
 0x186   : > { %1560 = vst [vmem:[%s2203_s9 + $0xe8] sm:$0xff] %v1496_v3  ;;  %1592 = vst [vmem:[%s2203_s9 + $0x1e8] sm:$0xff] %v1528_v4  ;;  %v1433_v7 = vadd.f32 %v2194_v17, %v1066_v5  ;;  %v1465_v8 = vadd.f32 %v2194_v17, %v1194_v6 }
 0x187   : > { %v1068_v9 = vpop.f32.mrf.mxu0  ;;  %v1196_v10 = vpop.f32.mrf.mxu1 }
 0x188   : > { %v1497_v11 = vmax.f32 %v1433_v7, 0.0  ;;  %v1529_v12 = vmax.f32 %v1465_v8, 0.0 }
 0x189   : > { %v1069_v13 = vpop.f32.mrf.mxu0  ;;  %v1197_v14 = vpop.f32.mrf.mxu1 }
 0x18a   : > { %1561 = vst [vmem:[%s2203_s9 + $0xf0] sm:$0xff] %v1497_v11  ;;  %1593 = vst [vmem:[%s2203_s9 + $0x1f0] sm:$0xff] %v1529_v12  ;;  %v1434_v15 = vadd.f32 %v2194_v17, %v1069_v13  ;;  %v1466_v16 = vadd.f32 %v2194_v17, %v1197_v14 }
 0x18b   : > { %v1071_v18 = vpop.f32.mrf.mxu0  ;;  %v1199_v19 = vpop.f32.mrf.mxu1 }
 0x18c   : > { %v1498_v20 = vmax.f32 %v1434_v15, 0.0  ;;  %v1530_v21 = vmax.f32 %v1466_v16, 0.0 }
 0x18e   : > { %1562 = vst [vmem:[%s2203_s9 + $0xf8] sm:$0xff] %v1498_v20  ;;  %1594 = vst [vmem:[%s2203_s9 + $0x1f8] sm:$0xff] %v1530_v21 }
 0x18f PF: > { %s13_s14 = sadd.s32 1, %s1996_s14   ;;  %s2344_s12 = smov %s1992_s13 }
 0x190   : > { %p10_p5 = scmp.ge.s32.totalorder %s13_s14, 6   ;;  %s2345_s13 = smov %s2347_s15 }
 0x192   :  { %12 = sbr.rel (!%p10_p5) target bundleno = 2 (0x2), region = 76 }

</bundles_post_ra>
